<compile_context>
chip_gen: v7x
topology: tpu7x:2x2x1
jax: 0.10.0
libtpu: 0.0.40
codegen_flags: <defaults>
</compile_context>

<pallas_src>
import functools

import jax
import jax.numpy as jnp
from jax.experimental import pallas as pl
from jax.experimental.pallas import tpu as pltpu


def _round_up(x, m):
    return (x + m - 1) // m * m


def _pick_token_tile(l_pad, token_tile):
    """Largest multiple of 128 that divides l_pad and is <= token_tile."""
    n = l_pad // 128
    best = 1
    for d in range(1, n + 1):
        if n % d == 0 and d * 128 <= token_tile:
            best = d
    return best * 128


def _patch_embed_kernel(x_ref, w_ref, p_ref, o_ref, *, eps, use_norm):
    # x_ref: (K, T)   flattened patches, tokens on the lane axis
    # w_ref: (E, K)   conv weight reshaped (E = embed_dim, K = C*p*p)
    # p_ref: (E, 3)   packed [bias | gamma | beta] columns (f32)
    # o_ref: (E, T)   output tile (tokens on lanes -> dense stores)
    y = jnp.dot(w_ref[...], x_ref[...], preferred_element_type=jnp.float32)
    y = y + p_ref[:, 0:1].astype(jnp.float32)                 # conv bias
    if use_norm:
        # LayerNorm over embed_dim (sublane axis) per token.
        mean = jnp.mean(y, axis=0, keepdims=True)
        var = jnp.mean(jnp.square(y - mean), axis=0, keepdims=True)
        y = (y - mean) * jax.lax.rsqrt(var + eps)
        y = y * p_ref[:, 1:2].astype(jnp.float32) + p_ref[:, 2:3].astype(jnp.float32)
    o_ref[...] = y.astype(o_ref.dtype)


def patch_embed_forward(x, params, *, patch_size=4, use_norm=True, eps=1e-5,
                        token_tile=2048, compute_dtype=None):
    """x: (B, C, H, W). Returns (B, embed_dim, Hp, Wp) — same as the PyTorch module."""
    w = params["proj_w"]          # (E, C, p, p)  PyTorch Conv2d weight layout
    b = params["proj_b"]          # (E,)
    gamma = params["norm_w"]      # (E,)
    beta = params["norm_b"]       # (E,)

    p = patch_size
    B, C, H, W = x.shape
    E = w.shape[0]

    # Same padding semantics as the PyTorch forward (pad right/bottom only).
    if W % p != 0:
        x = jnp.pad(x, ((0, 0), (0, 0), (0, 0), (0, p - W % p)))
    if H % p != 0:
        x = jnp.pad(x, ((0, 0), (0, 0), (0, p - H % p), (0, 0)))
    H2, W2 = x.shape[2], x.shape[3]
    Hp, Wp = H2 // p, W2 // p
    L = Hp * Wp
    K = C * p * p

    # Patch gather (done once by XLA on HBM):
    # (B,C,Hp,p,Wp,p) -> (B,C,p,p,Hp,Wp) -> (B, K, L); K inner order (c,kh,kw),
    # tokens ordered (hp, wp) — matches the NCHW output flattening directly.
    xt = x.reshape(B, C, Hp, p, Wp, p)
    xt = jnp.transpose(xt, (0, 1, 3, 5, 2, 4)).reshape(B, K, L)

    # Conv weight -> (E, K); same K inner order, no transpose needed.
    wm = w.reshape(E, K)

    if compute_dtype is not None:
        xt = xt.astype(compute_dtype)
        wm = wm.astype(compute_dtype)

    # Pack bias / gamma / beta into one (E, 3) operand (kept in f32).
    packed = jnp.stack([b, gamma, beta], axis=1).astype(jnp.float32)

    # Token tiling: tokens on the lane axis; tile is a multiple of 128 lanes.
    L_pad = _round_up(L, 128)
    TL = _pick_token_tile(L_pad, max(128, token_tile))
    if L_pad != L:
        xt = jnp.pad(xt, ((0, 0), (0, 0), (0, L_pad - L)))
    grid = (B, L_pad // TL)

    kernel = functools.partial(_patch_embed_kernel, eps=eps, use_norm=use_norm)

    out_flat = pl.pallas_call(
        kernel,
        out_shape=jax.ShapeDtypeStruct((B, E, L_pad), x.dtype),
        grid_spec=pltpu.PrefetchScalarGridSpec(
            num_scalar_prefetch=0,
            grid=grid,
            in_specs=[
                pl.BlockSpec((None, K, TL), lambda bi, j: (bi, 0, j)),  # patches (tiled)
                pl.BlockSpec((E, K), lambda bi, j: (0, 0)),             # weight (resident)
                pl.BlockSpec((E, 3), lambda bi, j: (0, 0)),             # bias/gamma/beta
            ],
            out_specs=pl.BlockSpec((None, E, TL), lambda bi, j: (bi, 0, j)),
        ),
        compiler_params=pltpu.CompilerParams(
            dimension_semantics=("parallel", "parallel"),
        ),
    )(xt, wm, packed)

    out = out_flat[:, :, :L] if L_pad != L else out_flat
    # (B, E, L) is already the NCHW slab -> free reshape, no transpose.
    return out.reshape(B, E, Hp, Wp)


def _reference_forward(x, params, *, patch_size=4, use_norm=True, eps=1e-5):
    """Pure-JAX reference (mirrors the PyTorch forward) for sanity checking."""
    w, b = params["proj_w"], params["proj_b"]
    gamma, beta = params["norm_w"], params["norm_b"]
    p = patch_size
    B, C, H, W = x.shape
    if W % p != 0:
        x = jnp.pad(x, ((0, 0), (0, 0), (0, 0), (0, p - W % p)))
    if H % p != 0:
        x = jnp.pad(x, ((0, 0), (0, 0), (0, p - H % p), (0, 0)))
    y = jax.lax.conv_general_dilated(
        x, w, window_strides=(p, p), padding="VALID",
        dimension_numbers=("NCHW", "OIHW", "NCHW"))
    y = y + b.reshape(1, -1, 1, 1)
    if use_norm:
        B_, E, Hp, Wp = y.shape
        t = y.reshape(B_, E, Hp * Wp).transpose(0, 2, 1)       # (B, L, E)
        mean = jnp.mean(t, axis=-1, keepdims=True)
        var = jnp.mean(jnp.square(t - mean), axis=-1, keepdims=True)
        t = (t - mean) / jnp.sqrt(var + eps) * gamma + beta
        y = t.transpose(0, 2, 1).reshape(B_, E, Hp, Wp)
    return y


if __name__ == "__main__":
    key = jax.random.PRNGKey(0)
    k_x, k_w, k_b, k_g, k_be, k_x2 = jax.random.split(key, 6)

    B, C, H, W = 2, 4, 16, 16
    patch_size = 4
    embed_dim = 32

    x = jax.random.normal(k_x, (B, C, H, W), dtype=jnp.float32)

    params = {
        "proj_w": jax.random.normal(k_w, (embed_dim, C, patch_size, patch_size),
                                    dtype=jnp.float32) * 0.05,
        "proj_b": jax.random.normal(k_b, (embed_dim,), dtype=jnp.float32) * 0.01,
        "norm_w": 1.0 + 0.1 * jax.random.normal(k_g, (embed_dim,), dtype=jnp.float32),
        "norm_b": 0.1 * jax.random.normal(k_be, (embed_dim,), dtype=jnp.float32),
    }

    # f32 matmul operands: tight check against the reference.
    out = patch_embed_forward(x, params, patch_size=patch_size, use_norm=True)
    out = jax.block_until_ready(out)
    ref = _reference_forward(x, params, patch_size=patch_size, use_norm=True)
    ref = jax.block_until_ready(ref)
    assert out.shape == (B, embed_dim, H // patch_size, W // patch_size), out.shape
    assert jnp.allclose(out, ref, atol=1e-4, rtol=1e-4), float(jnp.max(jnp.abs(out - ref)))

    # bf16 matmul operands (halved HBM traffic, native MXU path); f32 accumulate
    # and LayerNorm -> looser tolerance.
    out_bf16 = patch_embed_forward(x, params, patch_size=patch_size, use_norm=True,
                                   compute_dtype=jnp.bfloat16)
    out_bf16 = jax.block_until_ready(out_bf16)
    assert jnp.allclose(out_bf16, ref, atol=5e-2, rtol=5e-2), \
        float(jnp.max(jnp.abs(out_bf16 - ref)))

    # Non-divisible spatial size: exercises the right/bottom padding path and the
    # non-trivial token-padding / tile-selection logic (no divisibility assert).
    x2 = jax.random.normal(k_x2, (B, C, 18, 14), dtype=jnp.float32)
    out2 = patch_embed_forward(x2, params, patch_size=patch_size, use_norm=True)
    out2 = jax.block_until_ready(out2)
    ref2 = _reference_forward(x2, params, patch_size=patch_size, use_norm=True)
    assert out2.shape == ref2.shape, (out2.shape, ref2.shape)
    assert jnp.allclose(out2, ref2, atol=1e-4, rtol=1e-4), \
        float(jnp.max(jnp.abs(out2 - ref2)))

    print("KERNEL_OK")
</pallas_src>

<mosaic_0001>
module attributes {stable_mosaic.version = 11 : i64} {
  func.func @_patch_embed_kernel(%arg0: i32, %arg1: i32, %arg2: memref<1x64x128xf32, #tpu.memory_space<vmem>>, %arg3: memref<32x64xf32, #tpu.memory_space<vmem>>, %arg4: memref<32x3xf32, #tpu.memory_space<vmem>>, %arg5: memref<1x32x128xf32, #tpu.memory_space<vmem>>) attributes {dimension_semantics = [#tpu.dimension_semantics<parallel>, #tpu.dimension_semantics<parallel>], iteration_bounds = array<i64: 2, 1>, scalar_prefetch = 0 : i64, scratch_operands = 0 : i64, tpu.core_type = #tpu.core_type<tc>, window_params = [{transform_indices = @transform_0, window_bounds = array<i64: 1, 64, 128>}, {pipeline_mode = #tpu.pipeline_mode<synchronous>, transform_indices = @transform_1, window_bounds = array<i64: 32, 64>}, {pipeline_mode = #tpu.pipeline_mode<synchronous>, transform_indices = @transform_2, window_bounds = array<i64: 32, 3>}, {transform_indices = @transform_3, window_bounds = array<i64: 1, 32, 128>}]} {
    %c0 = arith.constant 0 : index
    %c0_0 = arith.constant 0 : index
    %0 = vector.load %arg3[%c0, %c0_0] : memref<32x64xf32, #tpu.memory_space<vmem>>, vector<32x64xf32>
    %c0_1 = arith.constant 0 : index
    %c0_2 = arith.constant 0 : index
    %c0_3 = arith.constant 0 : index
    %1 = vector.load %arg2[%c0_1, %c0_2, %c0_3] : memref<1x64x128xf32, #tpu.memory_space<vmem>>, vector<1x64x128xf32>
    %2 = vector.shape_cast %1 : vector<1x64x128xf32> to vector<64x128xf32>
    %cst = arith.constant dense<0.000000e+00> : vector<32x128xf32>
    %3 = tpu.matmul %0, %2, %cst {dimension_numbers = #tpu.dot_dimension_numbers<[1], [0], [0], [1], [0, 0, 1, 1], [], []>} : vector<32x64xf32>, vector<64x128xf32>, vector<32x128xf32> -> vector<32x128xf32>
    %c0_4 = arith.constant 0 : index
    %c0_5 = arith.constant 0 : index
    %4 = vector.load %arg4[%c0_4, %c0_5] : memref<32x3xf32, #tpu.memory_space<vmem>>, vector<32x1xf32>
    %5 = vector.broadcast %4 : vector<32x1xf32> to vector<32x128xf32>
    %6 = arith.addf %3, %5 : vector<32x128xf32>
    %cst_6 = arith.constant dense<0.000000e+00> : vector<128xf32>
    %7 = vector.multi_reduction <add>, %6, %cst_6 [0] : vector<32x128xf32> to vector<128xf32>
    %8 = vector.shape_cast %7 : vector<128xf32> to vector<1x128xf32>
    %cst_7 = arith.constant 3.200000e+01 : f32
    %9 = vector.broadcast %cst_7 : f32 to vector<1x128xf32>
    %10 = arith.divf %8, %9 : vector<1x128xf32>
    %11 = vector.broadcast %10 : vector<1x128xf32> to vector<32x128xf32>
    %12 = arith.subf %6, %11 : vector<32x128xf32>
    %13 = arith.mulf %12, %12 : vector<32x128xf32>
    %cst_8 = arith.constant dense<0.000000e+00> : vector<128xf32>
    %14 = vector.multi_reduction <add>, %13, %cst_8 [0] : vector<32x128xf32> to vector<128xf32>
    %15 = vector.shape_cast %14 : vector<128xf32> to vector<1x128xf32>
    %cst_9 = arith.constant 3.200000e+01 : f32
    %16 = vector.broadcast %cst_9 : f32 to vector<1x128xf32>
    %17 = arith.divf %15, %16 : vector<1x128xf32>
    %18 = vector.broadcast %10 : vector<1x128xf32> to vector<32x128xf32>
    %19 = arith.subf %6, %18 : vector<32x128xf32>
    %cst_10 = arith.constant 9.99999974E-6 : f32
    %20 = vector.broadcast %cst_10 : f32 to vector<1x128xf32>
    %21 = arith.addf %17, %20 : vector<1x128xf32>
    %22 = math.rsqrt %21 : vector<1x128xf32>
    %23 = vector.broadcast %22 : vector<1x128xf32> to vector<32x128xf32>
    %24 = arith.mulf %19, %23 : vector<32x128xf32>
    %c0_11 = arith.constant 0 : index
    %c1 = arith.constant 1 : index
    %25 = vector.load %arg4[%c0_11, %c1] : memref<32x3xf32, #tpu.memory_space<vmem>>, vector<32x1xf32>
    %26 = vector.broadcast %25 : vector<32x1xf32> to vector<32x128xf32>
    %27 = arith.mulf %24, %26 : vector<32x128xf32>
    %c0_12 = arith.constant 0 : index
    %c2 = arith.constant 2 : index
    %28 = vector.load %arg4[%c0_12, %c2] : memref<32x3xf32, #tpu.memory_space<vmem>>, vector<32x1xf32>
    %29 = vector.broadcast %28 : vector<32x1xf32> to vector<32x128xf32>
    %30 = arith.addf %27, %29 : vector<32x128xf32>
    %c0_13 = arith.constant 0 : index
    %c0_14 = arith.constant 0 : index
    %c0_15 = arith.constant 0 : index
    %31 = vector.load %arg5[%c0_13, %c0_14, %c0_15] : memref<1x32x128xf32, #tpu.memory_space<vmem>>, vector<1x32x128xf32>
    %32 = vector.shape_cast %31 : vector<1x32x128xf32> to vector<32x128xf32>
    %33 = vector.shape_cast %30 : vector<32x128xf32> to vector<1x32x128xf32>
    tpu.vector_store %arg5[%c0_13, %c0_14, %c0_15], %33 {strides = array<i32>} : memref<1x32x128xf32, #tpu.memory_space<vmem>>, vector<1x32x128xf32>,
    return
  }
  func.func @transform_0(%arg0: i32, %arg1: i32) -> (i32, i32, i32) {
    %c0_i32 = arith.constant 0 : i32
    %c0_i32_0 = arith.constant 0 : i32
    return %arg0, %c0_i32, %arg1 : i32, i32, i32
  }
  func.func @transform_1(%arg0: i32, %arg1: i32) -> (i32, i32) {
    %c0_i32 = arith.constant 0 : i32
    %c0_i32_0 = arith.constant 0 : i32
    %c0_i32_1 = arith.constant 0 : i32
    return %c0_i32, %c0_i32_0 : i32, i32
  }
  func.func @transform_2(%arg0: i32, %arg1: i32) -> (i32, i32) {
    %c0_i32 = arith.constant 0 : i32
    %c0_i32_0 = arith.constant 0 : i32
    %c0_i32_1 = arith.constant 0 : i32
    return %c0_i32, %c0_i32_0 : i32, i32
  }
  func.func @transform_3(%arg0: i32, %arg1: i32) -> (i32, i32, i32) {
    %c0_i32 = arith.constant 0 : i32
    %c0_i32_0 = arith.constant 0 : i32
    return %arg0, %c0_i32, %arg1 : i32, i32, i32
  }
}

</mosaic_0001>

<bundles_post_ra>
// kernel: tpu_custom_call.1
= control target key start
LH: loop header
LB: loop body
LE: loop exit
PB: predicated region body
PF: predicated region fallthrough
CT: control target
= control target key end

     0   :  { %8 = vsyncpa [#allocation3], 0  ;;  %s1022_s0 = inlined_call_operand.hbm [shape: f32[2,64,128], index: 0, kind: input, shape index: {}]   ;;  %s1023_s1 = inlined_call_operand.vmem [shape: f32[32,64], index: 1, kind: input, shape index: {}]   ;;  %s1024_s2 = inlined_call_operand.vmem [shape: f32[32,3], index: 2, kind: input, shape index: {}]   ;;  %s1025_s3 = inlined_call_operand.hbm [shape: f32[2,32,128], index: 3, kind: output, shape index: {}]  }
   0x1   :  { %10 = vsyncpa [#allocation3 + $0x1], 0 }
   0x2   :  { %11 = vsyncpa [#allocation4], 0 }
   0x3   :  { %13 = vsyncpa [#allocation4 + $0x1], 0  ;;  %s818_s12 = smov 0   ;;  %s820_s13 = smov 0  }
   0x4   :  { %s822_s14 = smov 0   ;;  %s824_s15 = smov 0  }
   0x5   :  { %s826_s16 = smov 0   ;;  %s828_s17 = smov 0  }
   0x6 LB: > { %s519_s18 = sadd.s32 4294967295, %s787_s17   ;;  %s520_s19 = sadd.s32 4294967294, %s787_s17   ;;  %s787_s17 = sphi %s828_s17, %s19_s17   ;;  %s783_s16 = sphi %s826_s16, %s1040_s16   ;;  %s779_s15 = sphi %s824_s15, %s1039_s15   ;;  %s775_s14 = sphi %s822_s14, %s1038_s14   ;;  %s771_s13 = sphi %s820_s13, %s1037_s13   ;;  %s767_s12 = sphi %s818_s12, %s1036_s12  }
   0x7   : > { %s31_s20 = sadd.s32 1, %s783_s16  ;;  %s40_s21 = sadd.s32 1, %s775_s14 }
   0x8   : > { %p33_p0 = scmp.ge.s32.totalorder %s31_s20, 2  ;;  %p47_p1 = scmp.ne.s32.totalorder %s775_s14, %s771_s13 }
   0x9   : > { %p48_p2 = scmp.eq.s32.totalorder %s787_s17, 0  ;;  %p53_p3 = scmp.ne.s32.totalorder %s771_s13, %s767_s12 }
   0xa   : > { %s1042_s20 = smov (%p33_p0, %s31_s20), 0  ;;  %p54_p5 = scmp.eq.s32.totalorder %s519_s18, 0 }
   0xb   : > { %p859_p4 = por %p48_p2, %p47_p1  ;;  %s35_s23 = ssub.s32 %s783_s16, %s1042_s20 }
   0xc   : > { %p121_p6 = scmp.eq.s32.totalorder %s519_s18, 1  ;;  %p38_p7 = scmp.eq.s32.totalorder %s35_s23, 0 }
   0xd   : > { %p865_p8 = por %p54_p5, %p53_p3  ;;  %p127_p10 = scmp.eq.s32.totalorder %s520_s19, 1 }
   0xe   : > { %p869_p9 = por %p121_p6, %p47_p1  ;;  %p610_p13 = scmp.lt.s32.totalorder %s787_s17, 2 }
   0xf   : > { %s874_s26 = scalar_select %p38_p7, %s775_s14, %s40_s21  }
  0x10   : > { %s1029_s25 = scalar_select %p869_p9, 1, 0 }
  0x11   : > { %p876_p11 = por %p127_p10, %p53_p3  ;;  %s153_s28 = sand.u32 1, %s775_s14  }
  0x12   : > { %s523_s29 = sshll.u32 %s153_s28, 6  ;;  %s538_s30 = sshll.u32 %s783_s16, 10 }
  0x13   : > { %s1030_s27 = scalar_select %p876_p11, 1, 0 }
  0x14   : > { %s887_s6 = scalar_lea.hbm %s1022_s0, %s538_s30  ;;  %s157_s7 = scalar_lea.vmem [#allocation2], %s523_s29 }
  0x15   : > { %s165_s8 = sshll.u32 %s157_s7, 4  ;;  %p893_p0 = pnand %p610_p13, %p859_p4  ;;  %s889_s8 = int_to_ptr.vmem [resolvable:$true] %s165_s8 }
  0x16   : > { %s898_s10 = scalar_lea.sflag [#allocation3], %s153_s28  ;;  %s675_s11 = scalar_lea.hbm %s887_s6, 1024 }
  0x17   : > { %p676_p2 = scmp.ne.s32.totalorder %s887_s6, %s675_s11  ;;  %p677_p3 = pneg %p893_p0 }
  0x18   : > { %s680_s21 = scalar_lea.hbm %s1022_s0, 2048  ;;  %p681_p4 = scmp.lt.u32.totalorder %s887_s6, %s1022_s0 }
  0x19   : > { %p678_p5 = pnand %p677_p3, %p676_p2  ;;  %p682_p7 = scmp.lt.u32.totalorder %s680_s21, %s675_s11 }
  0x1a   : > { %p684_p13 = scmp.lt.u32.totalorder %s675_s11, %s887_s6 }
  0x1b   : > { %p679_p6 = pneg %p678_p5  ;;  %p683_p10 = por %p682_p7, %p681_p4 }
  0x1d   : > { %p685_p12 = por %p684_p13, %p683_p10 }
  0x1f   : > { %p686_p1 = pnand %p685_p12, %p679_p6 }
  0x21   : > { %689 = shalt.err (!%p686_p1)
}
  0x22   : > { %s690_s28 = scalar_lea.vmem %s889_s8, 1024  ;;  %s789_s29 = smov [#allocation2]  }
  0x23   : > { %p691_p2 = scmp.ne.s32.totalorder %s889_s8, %s690_s28  ;;  %s695_s30 = sshll.u32 %s789_s29, 4  ;;  %s696_s30 = int_to_ptr.vmem [resolvable:$false] %s695_s30 }
  0x24   : > { %s697_s4 = scalar_lea.vmem %s696_s30, 2048  ;;  %p698_p9 = scmp.lt.s32.totalorder %s889_s8, %s696_s30 }
  0x25   : > { %p693_p5 = pnand %p691_p2, %p677_p3  ;;  %p699_p4 = scmp.lt.s32.totalorder %s697_s4, %s690_s28 }
  0x27   : > { %p694_p11 = pneg %p693_p5  ;;  %p700_p7 = por %p699_p4, %p698_p9 }
  0x29   : > { %p701_p10 = pnand %p700_p7, %p694_p11 }
  0x2b   : > { %704 = shalt.err (!%p701_p10)
}
  0x2c   : > { %s790_s5 = smov 128   ;;  %s791_s7 = smov 8  }
  0x2d   : > { %605 = dma.hbm_to_vmem [thread:$0]  (!%p893_p0), %s887_s6, 1024, %s889_s8, %s898_s10, %s790_s5, %s790_s5, %s791_s7  }
  0x2e   : > { %p173_p12 = scmp.lt.s32.totalorder %s787_s17, 3  ;;  %p1032_p1 = scmp.ge.s32.totalorder %s787_s17, 1 }
  0x30   : > { %p174_p3 = pnand %p1032_p1, %p173_p12 }
  0x31   : > { %s930_s11 = sand.u32 (!%p174_p3), 1, %s771_s13  }
  0x32   : > { %177 = sbr.rel (%p174_p3) target bundleno = 371 (0x173), region = 32  ;;  %s527_s18 = sshll.u32 (!%p174_p3), %s930_s11, 6 }
  0x33   : > { %s180_s19 = scalar_lea.sflag (!%p174_p3), [#allocation3], %s930_s11  ;;  %s183_s21 = scalar_lea.vmem (!%p174_p3), [#allocation2], %s527_s18 }
  0x39   : > { %758 = dma.done.wait (%p865_p8), %s180_s19, 1024  }
  0x3a   : > { %760 = vsyncadd (%p865_p8), %s180_s19, 4294966272  ;;  %v792_v0 = vmov 0   ;;  %v210_v1 = vld [vmem:[%s183_s21] sm:$0xff]  ;;  %v211_v2 = vld [vmem:[%s183_s21 + $0x8] sm:$0xff]  ;;  %vm242_vm0 = vcmask 523264   ;;  %v793_v19 = vmov 1  }
  0x3b   : > { %667 = vset.pattern.permute.xlu0 %v792_v0  ;;  %668 = vset.pattern.permute.xlu1 %v792_v0  ;;  %v212_v3 = vld [vmem:[%s183_s21 + $0x10] sm:$0xff]  ;;  %v574_v4 = vpack.c.bf16 %v211_v2, %v210_v1  ;;  %v213_v5 = vld [vmem:[%s183_s21 + $0x18] sm:$0xff]  ;;  %v214_v7 = vld [vmem:[%s183_s21 + $0x20] sm:$0xff]  ;;  %v794_v22 = vmov 2   ;;  %s528_s6 = sshll.u32 %s930_s11, 5  ;;  %s539_s9 = sshll.u32 %s779_s15, 9 }
  0x3c   : > { %v578_v6 = vpack.c.bf16 %v213_v5, %v212_v3  ;;  %v215_v8 = vld [vmem:[%s183_s21 + $0x28] sm:$0xff]  ;;  %v206_v9 = vld [vmem:[%s1023_s1] sm:$0xff]  ;;  %v208_v10 = vld [vmem:[%s1023_s1 + $0x10] sm:$0xff]  ;;  %s205_s8 = scalar_lea.vmem [#allocation5], %s528_s6  ;;  %s973_s23 = scalar_lea.hbm %s1025_s3, %s539_s9 }
  0x3d   : > { %575 = vmatprep.subr.bf16.mxu0 %v574_v4  ;;  %590 = vmatprep.subr.bf16.mxu1 %v574_v4  ;;  %v218_v11 = vld [vmem:[%s1024_s2] sm:$0xff]  ;;  %v220_v12 = vld [vmem:[%s1024_s2 + $0x10] sm:$0xff]  ;;  %v582_v13 = vpack.c.bf16 %v215_v8, %v214_v7  ;;  %v217_v15 = vld [vmem:[%s183_s21 + $0x38] sm:$0xff]  ;;  %s434_s24 = sshll.u32 %s205_s8, 4  ;;  %s420_s15 = scalar_lea.sflag [#allocation4], %s930_s11  ;;  %s968_s24 = int_to_ptr.vmem [resolvable:$true] %s434_s24 }
  0x3e   : > { %577 = vmatpush3.bf16.msra.mxu0 %v574_v4  ;;  %594 = vmatpush3.bf16.msra.mxu1 %v574_v4  ;;  %v216_v14 = vld [vmem:[%s183_s21 + $0x30] sm:$0xff]  ;;  %v219_v16 = vld [vmem:[%s1024_s2 + $0x8] sm:$0xff]  ;;  %v221_v17 = vld [vmem:[%s1024_s2 + $0x18] sm:$0xff]  ;;  %s705_s28 = scalar_lea.vmem %s968_s24, 512  ;;  %p1033_p9 = scmp.ne.s32.totalorder %s1029_s25, 0 }
  0x3f   : > { %579 = vmatprep.subr.bf16.mxu0 %v578_v6  ;;  %591 = vmatprep.subr.bf16.mxu1 %v578_v6  ;;  %v586_v18 = vpack.c.bf16 %v217_v15, %v216_v14  ;;  %v207_v20 = vld [vmem:[%s1023_s1 + $0x8] sm:$0xff]  ;;  %v209_v21 = vld [vmem:[%s1023_s1 + $0x18] sm:$0xff]  ;;  %p706_p8 = scmp.ne.s32.totalorder %s968_s24, %s705_s28  ;;  %s795_s29 = smov [#allocation5]  }
  0x40   : > { %568 = vmatprep.mubr.msk.f32.mxu0 %vm242_vm0, %v206_v9  ;;  %571 = vmatprep.mubr.msk.f32.mxu1 %vm242_vm0, %v208_v10  ;;  %s709_s30 = sshll.u32 %s795_s29, 4  ;;  %s710_s30 = int_to_ptr.vmem [resolvable:$false] %s709_s30 }
  0x41   : > { %224 = vperm.xlu0 %667, %v218_v11   ;;  %234 = vperm.xlu1 %668, %v220_v12   ;;  %p707_p11 = pnand %p706_p8, %p1033_p9  ;;  %s711_s4 = scalar_lea.vmem %s710_s30, 1024 }
  0x42   : > { %581 = vmatpush3.bf16.msra.mxu0 %v578_v6  ;;  %595 = vmatpush3.bf16.msra.mxu1 %v578_v6  ;;  %p712_p6 = scmp.lt.s32.totalorder %s968_s24, %s710_s30  ;;  %p713_p13 = scmp.lt.s32.totalorder %s711_s4, %s705_s28 }
  0x43   : > { %583 = vmatprep.subr.bf16.mxu0 %v582_v13  ;;  %592 = vmatprep.subr.bf16.mxu1 %v582_v13  ;;  %p708_p0 = pneg %p707_p11 }
  0x44   : > { %p714_p2 = por %p713_p13, %p712_p6 }
  0x45   : > { %229 = vperm.xlu0 %667, %v219_v16   ;;  %239 = vperm.xlu1 %668, %v221_v17  }
  0x46   : > { %585 = vmatpush3.bf16.msra.mxu0 %v582_v13  ;;  %596 = vmatpush3.bf16.msra.mxu1 %v582_v13  ;;  %p715_p5 = pnand %p714_p2, %p708_p0 }
  0x47   : > { %587 = vmatprep.subr.bf16.mxu0 %v586_v18  ;;  %593 = vmatprep.subr.bf16.mxu1 %v586_v18 }
  0x49   : > { %670 = vset.pattern.permute.xlu1 %v793_v19  ;;  %669 = vset.pattern.permute.xlu0 %v793_v19 }
  0x4a   : > { %589 = vmatpush3.bf16.msra.mxu0 %v586_v18  ;;  %597 = vmatpush3.bf16.msra.mxu1 %v586_v18 }
  0x4b   : > { %380 = vperm.xlu1 %670, %v219_v16   ;;  %376 = vperm.xlu0 %669, %v218_v11  }
  0x4d   : > { %569 = vmatmul.mubr.msk.f32.vlgmr.msra.gmra.mrb[0].mxu0 %vm242_vm0, %v207_v20  ;;  %572 = vmatmul.mubr.msk.f32.vlgmr.msra.gmra.mrb[0].mxu1 %vm242_vm0, %v209_v21 }
  0x4f   : > { %384 = vperm.xlu1 %670, %v220_v12   ;;  %388 = vperm.xlu0 %669, %v221_v17  }
  0x53   : > { %671 = vset.pattern.permute.xlu1 %v794_v22  ;;  %672 = vset.pattern.permute.xlu0 %v794_v22 }
  0x54   : > { %396 = vperm.xlu1 %671, %v218_v11   ;;  %400 = vperm.xlu0 %672, %v219_v16  }
  0x58   : > { %404 = vperm.xlu1 %671, %v220_v12  }
  0x5c   : > { %408 = vperm.xlu1 %671, %v221_v17  }
  0xc0   : > { %v225_v23 = vpop.permute.xlu0 %224  ;;  %v235_v24 = vpop.permute.xlu1 %234 }
  0xc4   : > { %v230_v25 = vpop.permute.xlu0 %229  ;;  %v240_v32 = vpop.permute.xlu1 %239 }
  0xca   : > { %v381_v59 = vpop.permute.xlu1 %380  ;;  %v377_v3 = vpop.permute.xlu0 %376 }
  0xce   : > { %v385_v0 = vpop.permute.xlu1 %384  ;;  %v389_v5 = vpop.permute.xlu0 %388 }
  0xd3   : > { %v397_v2 = vpop.permute.xlu1 %396  ;;  %v401_v11 = vpop.permute.xlu0 %400 }
  0xd7   : > { %v405_v4 = vpop.permute.xlu1 %404 }
  0xdb   : > { %v409_v16 = vpop.permute.xlu1 %408 }
 0x120   : > { %v570_v26 = vpop.f32.mrb[0].mxu0  ;;  %v573_v27 = vpop.f32.mrb[0].mxu1 }
 0x121   : > { %v327_v28 = vadd.f32 %v570_v26, %v230_v25  ;;  %v321_v29 = vpop.f32.mrb[1].mxu0  ;;  %v331_v30 = vpop.f32.mrb[1].mxu1  ;;  %v337_v35 = vadd.f32 %v573_v27, %v240_v32 }
 0x122   : > { %v322_v31 = vadd.f32 %v321_v29, %v225_v23  ;;  %v332_v34 = vadd.f32 %v331_v30, %v235_v24 }
 0x124   : > { %v340_v33 = vadd.f32 %v327_v28, %v322_v31 }
 0x126   : > { %v341_v36 = vadd.f32 %v340_v33, %v332_v34 }
 0x128   : > { %v342_v37 = vadd.f32 %v341_v36, %v337_v35 }
 0x12a   : > { %v343_v38 = vrot.slane %v342_v37, 4 }
 0x12c   : > { %v344_v39 = vadd.f32 %v343_v38, %v342_v37 }
 0x12e   : > { %v345_v40 = vrot.slane %v344_v39, 2 }
 0x130   : > { %v346_v41 = vadd.f32 %v345_v40, %v344_v39 }
 0x132   : > { %v347_v42 = vrot.slane %v346_v41, 1 }
 0x134   : > { %v348_v43 = vadd.f32 %v347_v42, %v346_v41 }
 0x136   : > { %v350_v44 = vmul.f32 0.03125, %v348_v43 }
 0x138   : > { %v353_v45 = vsub.f32 %v332_v34, %v350_v44  ;;  %v354_v46 = vsub.f32 %v337_v35, %v350_v44  ;;  %v351_v47 = vsub.f32 %v322_v31, %v350_v44  ;;  %v352_v48 = vsub.f32 %v327_v28, %v350_v44 }
 0x13a   : > { %v355_v49 = vmul.f32 %v351_v47, %v351_v47  ;;  %v356_v50 = vmul.f32 %v352_v48, %v352_v48  ;;  %v357_v51 = vmul.f32 %v353_v45, %v353_v45  ;;  %v358_v53 = vmul.f32 %v354_v46, %v354_v46 }
 0x13c   : > { %v359_v52 = vadd.f32 %v356_v50, %v355_v49 }
 0x13e   : > { %v360_v54 = vadd.f32 %v359_v52, %v357_v51 }
 0x140   : > { %v361_v55 = vadd.f32 %v360_v54, %v358_v53 }
 0x142   : > { %v362_v56 = vrot.slane %v361_v55, 4 }
 0x144   : > { %v363_v57 = vadd.f32 %v362_v56, %v361_v55 }
 0x146   : > { %v364_v58 = vrot.slane %v363_v57, 2 }
 0x148   : > { %v365_v60 = vadd.f32 %v364_v58, %v363_v57 }
 0x14a   : > { %v366_v61 = vrot.slane %v365_v60, 1 }
 0x14c   : > { %v367_v62 = vadd.f32 %v366_v61, %v365_v60 }
 0x14e   : > { %v368_v63 = vmul.f32 0.03125, %v367_v62 }
 0x150   : > { %v369_v1 = vadd.f32 1e-05, %v368_v63 }
 0x152   : > { %673 = vrsqrt.f32 %v369_v1 }
 0x15c   : > { %v674_v6 = vpop.eup %673 }
 0x15d   : > { %v372_v7 = vmul.f32 %v674_v6, %v352_v48  ;;  %v373_v8 = vmul.f32 %v674_v6, %v353_v45  ;;  %v371_v9 = vmul.f32 %v674_v6, %v351_v47  ;;  %v374_v10 = vmul.f32 %v674_v6, %v354_v46 }
 0x15f   : > { %v392_v12 = vmul.f32 %v381_v59, %v372_v7  ;;  %v393_v13 = vmul.f32 %v385_v0, %v373_v8  ;;  %v391_v14 = vmul.f32 %v377_v3, %v371_v9  ;;  %v394_v15 = vmul.f32 %v389_v5, %v374_v10 }
 0x161   : > { %v411_v17 = vadd.f32 %v397_v2, %v391_v14  ;;  %v413_v18 = vadd.f32 %v405_v4, %v393_v13  ;;  %v414_v19 = vadd.f32 %v409_v16, %v394_v15  ;;  %v412_v20 = vadd.f32 %v401_v11, %v392_v12 }
 0x163   : > { %415 = vst [vmem:[%s205_s8] sm:$0xff] %v411_v17  ;;  %417 = vst [vmem:[%s205_s8 + $0x10] sm:$0xff] %v413_v18 }
 0x164   : > { %418 = vst [vmem:[%s205_s8 + $0x18] sm:$0xff] %v414_v19  ;;  %416 = vst [vmem:[%s205_s8 + $0x8] sm:$0xff] %v412_v20 }
 0x165   : > { %718 = shalt.err (!%p715_p5)
}
 0x166   : > { %s719_s5 = scalar_lea.hbm %s973_s23, 512  ;;  %s723_s19 = scalar_lea.hbm %s1025_s3, 1024 }
 0x167   : > { %p720_p4 = scmp.ne.s32.totalorder %s973_s23, %s719_s5  ;;  %p724_p12 = scmp.lt.u32.totalorder %s973_s23, %s1025_s3 }
 0x168   : > { %p725_p1 = scmp.lt.u32.totalorder %s723_s19, %s719_s5  ;;  %p727_p8 = scmp.lt.u32.totalorder %s719_s5, %s973_s23 }
 0x169   : > { %p721_p7 = pnand %p720_p4, %p1033_p9 }
 0x16a   : > { %p726_p3 = por %p725_p1, %p724_p12 }
 0x16b   : > { %p722_p10 = pneg %p721_p7 }
 0x16c   : > { %p728_p11 = por %p727_p8, %p726_p3 }
 0x16e   : > { %p729_p0 = pnand %p728_p11, %p722_p10 }
 0x170   : > { %732 = shalt.err (!%p729_p0)
}
 0x171   : > { %s796_s8 = smov 128   ;;  %s797_s9 = smov 8  }
 0x172   : > { %600 = dma.vmem_to_hbm [thread:$0]  (%p1033_p9), %s968_s24, 512, %s973_s23, %s420_s15, %s796_s8, %s796_s8, %s797_s9  }
 0x173 PF: > { %s449_s10 = sand.u32 1, %s767_s12   ;;  %p1034_p6 = scmp.ne.s32.totalorder %s1030_s27, 0 }
 0x174   : > { %p1035_p13 = scmp.ge.s32.totalorder %s787_s17, 2  ;;  %s450_s22 = scalar_lea.sflag [#allocation4], %s449_s10 }
 0x176   : > { %p607_p2 = pnand %p1035_p13, %p1034_p6 }
 0x178   : > { %762 = dma.done.wait (!%p607_p2), %s450_s22, 512  }
 0x179   : > { %764 = vsyncadd (!%p607_p2), %s450_s22, 4294966784  ;;  %s19_s17 = sadd.s32 1, %s787_s17   ;;  %s1036_s12 = smov %s771_s13 }
 0x17a   : > { %p16_p5 = scmp.ge.s32.totalorder %s19_s17, 4   ;;  %s1037_s13 = smov %s775_s14 }
 0x17b   : > { %s1038_s14 = smov %s874_s26  ;;  %s1039_s15 = smov %s783_s16 }
 0x17c   : > { %s1040_s16 = smov %s1042_s20  ;;  %18 = sbr.rel (!%p16_p5) target bundleno = 6 (0x6), region = 77 }
 0x183   :  { %455 = vsyncpa [#allocation3], 1 }
 0x184   :  { %457 = vsyncpa [#allocation3 + $0x1], 1 }
 0x185   :  { %458 = vsyncpa [#allocation4], 1 }
 0x186   :  { %460 = vsyncpa [#allocation4 + $0x1], 1 }

</bundles_post_ra>
